<compile_context>
chip_gen: v5e
topology: v5e:2x2
jax: 0.10.0
libtpu: 0.0.40
codegen_flags: <defaults>
</compile_context>

<pallas_src>
import jax
import jax.numpy as jnp
from jax.experimental import pallas as pl
from jax.experimental.pallas import tpu as pltpu

OBS_DIM = 4          # CartPole observation_space.shape = (4,)
ACT_DIM = 1          # np.prod(action_space.shape) -> 1
D_IN = OBS_DIM + ACT_DIM   # 5
D_IN_PAD = 8         # sublane-padded contraction dim for fc1 (f32 sublane tile)
HIDDEN = 512
MAX_TILE_M = 256     # batch rows per grid step (fills v6e/v7x MXU; fine on v5e)


def _round_up(n, m):
    return ((n + m - 1) // m) * m


def _mlp_kernel(z_ref, w1_ref, b1_ref, w2_ref, b2_ref, w3_ref, b3_ref, o_ref):
    # z:  (TM, 8)  f32      w1: (8, 512)  f32     b1: (1, 512) f32
    # w2: (512, 512) bf16   b2: (1, 512)  f32
    # w3: (1, 512)  bf16    b3: (1, 1)    f32     o: (TM, 1)   f32
    h1 = jnp.dot(z_ref[...], w1_ref[...], preferred_element_type=jnp.float32)
    h1 = jnp.maximum(h1 + b1_ref[...], 0.0)

    h2 = jnp.dot(h1.astype(jnp.bfloat16), w2_ref[...],
                 preferred_element_type=jnp.float32)
    h2 = jnp.maximum(h2 + b2_ref[...], 0.0)

    # fc3 (512 -> 1) as an elementwise multiply + lane reduction (XLU slot),
    # avoiding a zero-padded 512x128 matmul and its DMA.
    q = jnp.sum(h2 * w3_ref[...].astype(jnp.float32), axis=-1, keepdims=True)
    o_ref[...] = q + b3_ref[...]


def prepare_params(params):
    """One-time layout/padding/dtype conversion of the raw Linear params."""
    w1, b1, w2, b2, w3, b3 = params
    w1p = jnp.zeros((D_IN_PAD, HIDDEN), jnp.float32).at[:D_IN, :].set(
        w1.astype(jnp.float32))                          # (8, 512)   f32, 16 KiB
    b1p = b1.reshape(1, HIDDEN).astype(jnp.float32)       # (1, 512)   f32
    w2p = w2.astype(jnp.bfloat16)                          # (512, 512) bf16, 512 KiB
    b2p = b2.reshape(1, HIDDEN).astype(jnp.float32)        # (1, 512)   f32
    w3p = w3.reshape(1, HIDDEN).astype(jnp.bfloat16)        # (1, 512)   bf16 row
    b3p = b3.reshape(1, 1).astype(jnp.float32)              # (1, 1)     f32
    return (w1p, b1p, w2p, b2p, w3p, b3p)


def _forward_padded(zp, prepared, tile_m):
    """zp: (B_pad, D_IN_PAD) f32 with B_pad % tile_m == 0. Returns (B_pad, 1)."""
    w1p, b1p, w2p, b2p, w3p, b3p = prepared
    b_pad = zp.shape[0]
    num_tiles = b_pad // tile_m

    flops = 2 * b_pad * (D_IN_PAD * HIDDEN + HIDDEN * HIDDEN + HIDDEN)
    bytes_accessed = int(
        zp.size * zp.dtype.itemsize
        + sum(int(p.size) * p.dtype.itemsize for p in prepared)
        + b_pad * 4  # output
    )

    return pl.pallas_call(
        _mlp_kernel,
        out_shape=jax.ShapeDtypeStruct((b_pad, 1), jnp.float32),
        grid=(num_tiles,),
        in_specs=[
            pl.BlockSpec((tile_m, D_IN_PAD), lambda i: (i, 0)),   # z tile
            pl.BlockSpec((D_IN_PAD, HIDDEN), lambda i: (0, 0)),   # w1 (resident)
            pl.BlockSpec((1, HIDDEN), lambda i: (0, 0)),          # b1
            pl.BlockSpec((HIDDEN, HIDDEN), lambda i: (0, 0)),     # w2 (resident)
            pl.BlockSpec((1, HIDDEN), lambda i: (0, 0)),          # b2
            pl.BlockSpec((1, HIDDEN), lambda i: (0, 0)),          # w3 row
            pl.BlockSpec((1, 1), lambda i: (0, 0)),               # b3
        ],
        out_specs=pl.BlockSpec((tile_m, 1), lambda i: (i, 0)),
        compiler_params=pltpu.CompilerParams(
            dimension_semantics=("parallel",),
        ),
        cost_estimate=pl.CostEstimate(
            flops=flops, transcendentals=0, bytes_accessed=bytes_accessed
        ),
    )(zp, w1p, b1p, w2p, b2p, w3p, b3p)


def soft_q_forward(x, a, prepared):
    """Single-sample forward, matching the PyTorch module: x (4,), a (1,) -> q (1,)."""
    z = jnp.concatenate([x, a], axis=0).astype(jnp.float32)          # (5,)
    zp = jnp.zeros((8, D_IN_PAD), jnp.float32).at[0, :D_IN].set(z)    # (8, 8) slab
    out = _forward_padded(zp, prepared, tile_m=8)                     # (8, 1)
    return out[0]                                                     # (1,)


def soft_q_forward_batched(xb, ab, prepared):
    """Batched forward (SAC-training shape): xb (B, 4), ab (B, 1) -> q (B, 1)."""
    B = xb.shape[0]
    z = jnp.concatenate([xb, ab], axis=1).astype(jnp.float32)         # (B, 5)
    tile_m = min(MAX_TILE_M, _round_up(B, 8))
    b_pad = _round_up(B, tile_m)
    zp = jnp.zeros((b_pad, D_IN_PAD), jnp.float32).at[:B, :D_IN].set(z)
    out = _forward_padded(zp, prepared, tile_m)                       # (b_pad, 1)
    return out[:B]                                                    # (B, 1)


def init_params(key):
    """Deterministic init matching nn.Linear's default U(-1/sqrt(fan_in), ...)."""
    ks = jax.random.split(key, 6)

    def lin(kw, kb, fan_in, fan_out):
        bound = 1.0 / jnp.sqrt(jnp.float32(fan_in))
        w = jax.random.uniform(kw, (fan_in, fan_out), jnp.float32, -bound, bound)
        b = jax.random.uniform(kb, (fan_out,), jnp.float32, -bound, bound)
        return w, b

    w1, b1 = lin(ks[0], ks[1], D_IN, HIDDEN)
    w2, b2 = lin(ks[2], ks[3], HIDDEN, HIDDEN)
    w3, b3 = lin(ks[4], ks[5], HIDDEN, 1)
    return (w1, b1, w2, b2, w3, b3)


def reference_forward(x, a, params):
    """Pure-JAX f32 reference for correctness checking (single sample)."""
    w1, b1, w2, b2, w3, b3 = params
    z = jnp.concatenate([x, a], axis=0)
    h1 = jnp.maximum(z @ w1 + b1, 0.0)
    h2 = jnp.maximum(h1 @ w2 + b2, 0.0)
    return h2 @ w3 + b3


if __name__ == "__main__":
    key = jax.random.PRNGKey(0)
    kp, kx, ka, kbx, kba = jax.random.split(key, 5)

    params = init_params(kp)
    prepared = prepare_params(params)   # one-time padding / bf16 cast

    # Single-sample path (module semantics: torch.cat([x, a], 0) on 1-D inputs).
    x = jax.random.normal(kx, (OBS_DIM,), jnp.float32)
    a = jax.random.normal(ka, (ACT_DIM,), jnp.float32)
    q = jax.block_until_ready(soft_q_forward(x, a, prepared))
    q_ref = reference_forward(x, a, params)
    assert q.shape == (1,)
    # bf16 weights for fc2/fc3 -> allow ~1e-2-level deviation from the f32 reference.
    assert jnp.allclose(q, q_ref, atol=2e-2, rtol=2e-2), (q, q_ref)

    # Small batched path (weights VMEM-resident across the batch grid).
    B = 32
    xb = jax.random.normal(kbx, (B, OBS_DIM), jnp.float32)
    ab = jax.random.normal(kba, (B, ACT_DIM), jnp.float32)
    qb = jax.block_until_ready(soft_q_forward_batched(xb, ab, prepared))
    qb_ref = jax.vmap(lambda xx, aa: reference_forward(xx, aa, params))(xb, ab)
    assert qb.shape == (B, 1)
    assert jnp.allclose(qb, qb_ref, atol=2e-2, rtol=2e-2), (qb, qb_ref)

    print("KERNEL_OK")
</pallas_src>

<mosaic_0001>
module attributes {stable_mosaic.version = 11 : i64} {
  func.func @_mlp_kernel(%arg0: i32, %arg1: memref<8x8xf32, #tpu.memory_space<vmem>>, %arg2: memref<8x512xf32, #tpu.memory_space<vmem>>, %arg3: memref<1x512xf32, #tpu.memory_space<vmem>>, %arg4: memref<512x512xbf16, #tpu.memory_space<vmem>>, %arg5: memref<1x512xf32, #tpu.memory_space<vmem>>, %arg6: memref<1x512xbf16, #tpu.memory_space<vmem>>, %arg7: memref<1x1xf32, #tpu.memory_space<vmem>>, %arg8: memref<8x1xf32, #tpu.memory_space<vmem>>) attributes {dimension_semantics = [#tpu.dimension_semantics<parallel>], iteration_bounds = array<i64: 1>, scalar_prefetch = 0 : i64, scratch_operands = 0 : i64, tpu.core_type = #tpu.core_type<tc>, window_params = [{transform_indices = @transform_0, window_bounds = array<i64: 8, 8>}, {pipeline_mode = #tpu.pipeline_mode<synchronous>, transform_indices = @transform_1, window_bounds = array<i64: 8, 512>}, {pipeline_mode = #tpu.pipeline_mode<synchronous>, transform_indices = @transform_2, window_bounds = array<i64: 1, 512>}, {pipeline_mode = #tpu.pipeline_mode<synchronous>, transform_indices = @transform_3, window_bounds = array<i64: 512, 512>}, {pipeline_mode = #tpu.pipeline_mode<synchronous>, transform_indices = @transform_4, window_bounds = array<i64: 1, 512>}, {pipeline_mode = #tpu.pipeline_mode<synchronous>, transform_indices = @transform_5, window_bounds = array<i64: 1, 512>}, {pipeline_mode = #tpu.pipeline_mode<synchronous>, transform_indices = @transform_6, window_bounds = array<i64: 1, 1>}, {transform_indices = @transform_7, window_bounds = array<i64: 8, 1>}]} {
    %c0 = arith.constant 0 : index
    %c0_0 = arith.constant 0 : index
    %0 = vector.load %arg1[%c0, %c0_0] : memref<8x8xf32, #tpu.memory_space<vmem>>, vector<8x8xf32>
    %c0_1 = arith.constant 0 : index
    %c0_2 = arith.constant 0 : index
    %1 = vector.load %arg2[%c0_1, %c0_2] : memref<8x512xf32, #tpu.memory_space<vmem>>, vector<8x512xf32>
    %cst = arith.constant dense<0.000000e+00> : vector<8x512xf32>
    %2 = tpu.matmul %0, %1, %cst {dimension_numbers = #tpu.dot_dimension_numbers<[1], [0], [0], [1], [0, 0, 1, 1], [], []>} : vector<8x8xf32>, vector<8x512xf32>, vector<8x512xf32> -> vector<8x512xf32>
    %c0_3 = arith.constant 0 : index
    %c0_4 = arith.constant 0 : index
    %3 = vector.load %arg3[%c0_3, %c0_4] : memref<1x512xf32, #tpu.memory_space<vmem>>, vector<1x512xf32>
    %4 = vector.broadcast %3 : vector<1x512xf32> to vector<8x512xf32>
    %5 = arith.addf %2, %4 : vector<8x512xf32>
    %cst_5 = arith.constant 0.000000e+00 : f32
    %6 = vector.broadcast %cst_5 : f32 to vector<8x512xf32>
    %7 = arith.maximumf %5, %6 : vector<8x512xf32>
    %8 = arith.truncf %7 : vector<8x512xf32> to vector<8x512xbf16>
    %c0_6 = arith.constant 0 : index
    %c0_7 = arith.constant 0 : index
    %9 = vector.load %arg4[%c0_6, %c0_7] : memref<512x512xbf16, #tpu.memory_space<vmem>>, vector<512x512xbf16>
    %cst_8 = arith.constant dense<0.000000e+00> : vector<8x512xf32>
    %10 = tpu.matmul %8, %9, %cst_8 {dimension_numbers = #tpu.dot_dimension_numbers<[1], [0], [0], [1], [0, 0, 1, 1], [], []>} : vector<8x512xbf16>, vector<512x512xbf16>, vector<8x512xf32> -> vector<8x512xf32>
    %c0_9 = arith.constant 0 : index
    %c0_10 = arith.constant 0 : index
    %11 = vector.load %arg5[%c0_9, %c0_10] : memref<1x512xf32, #tpu.memory_space<vmem>>, vector<1x512xf32>
    %12 = vector.broadcast %11 : vector<1x512xf32> to vector<8x512xf32>
    %13 = arith.addf %10, %12 : vector<8x512xf32>
    %cst_11 = arith.constant 0.000000e+00 : f32
    %14 = vector.broadcast %cst_11 : f32 to vector<8x512xf32>
    %15 = arith.maximumf %13, %14 : vector<8x512xf32>
    %c0_12 = arith.constant 0 : index
    %c0_13 = arith.constant 0 : index
    %16 = vector.load %arg6[%c0_12, %c0_13] : memref<1x512xbf16, #tpu.memory_space<vmem>>, vector<1x512xbf16>
    %17 = arith.extf %16 : vector<1x512xbf16> to vector<1x512xf32>
    %18 = vector.broadcast %17 : vector<1x512xf32> to vector<8x512xf32>
    %19 = arith.mulf %15, %18 : vector<8x512xf32>
    %cst_14 = arith.constant dense<0.000000e+00> : vector<8xf32>
    %20 = vector.multi_reduction <add>, %19, %cst_14 [1] : vector<8x512xf32> to vector<8xf32>
    %21 = vector.shape_cast %20 : vector<8xf32> to vector<8x1xf32>
    %c0_15 = arith.constant 0 : index
    %c0_16 = arith.constant 0 : index
    %22 = vector.load %arg7[%c0_15, %c0_16] : memref<1x1xf32, #tpu.memory_space<vmem>>, vector<1x1xf32>
    %23 = vector.broadcast %22 : vector<1x1xf32> to vector<8x1xf32>
    %24 = arith.addf %21, %23 : vector<8x1xf32>
    %c0_17 = arith.constant 0 : index
    %c0_18 = arith.constant 0 : index
    %25 = vector.load %arg8[%c0_17, %c0_18] : memref<8x1xf32, #tpu.memory_space<vmem>>, vector<8x1xf32>
    tpu.vector_store %arg8[%c0_17, %c0_18], %24 {strides = array<i32>} : memref<8x1xf32, #tpu.memory_space<vmem>>, vector<8x1xf32>,
    return
  }
  func.func @transform_0(%arg0: i32) -> (i32, i32) {
    %c0_i32 = arith.constant 0 : i32
    %c0_i32_0 = arith.constant 0 : i32
    return %arg0, %c0_i32 : i32, i32
  }
  func.func @transform_1(%arg0: i32) -> (i32, i32) {
    %c0_i32 = arith.constant 0 : i32
    %c0_i32_0 = arith.constant 0 : i32
    %c0_i32_1 = arith.constant 0 : i32
    return %c0_i32, %c0_i32_0 : i32, i32
  }
  func.func @transform_2(%arg0: i32) -> (i32, i32) {
    %c0_i32 = arith.constant 0 : i32
    %c0_i32_0 = arith.constant 0 : i32
    %c0_i32_1 = arith.constant 0 : i32
    return %c0_i32, %c0_i32_0 : i32, i32
  }
  func.func @transform_3(%arg0: i32) -> (i32, i32) {
    %c0_i32 = arith.constant 0 : i32
    %c0_i32_0 = arith.constant 0 : i32
    %c0_i32_1 = arith.constant 0 : i32
    return %c0_i32, %c0_i32_0 : i32, i32
  }
  func.func @transform_4(%arg0: i32) -> (i32, i32) {
    %c0_i32 = arith.constant 0 : i32
    %c0_i32_0 = arith.constant 0 : i32
    %c0_i32_1 = arith.constant 0 : i32
    return %c0_i32, %c0_i32_0 : i32, i32
  }
  func.func @transform_5(%arg0: i32) -> (i32, i32) {
    %c0_i32 = arith.constant 0 : i32
    %c0_i32_0 = arith.constant 0 : i32
    %c0_i32_1 = arith.constant 0 : i32
    return %c0_i32, %c0_i32_0 : i32, i32
  }
  func.func @transform_6(%arg0: i32) -> (i32, i32) {
    %c0_i32 = arith.constant 0 : i32
    %c0_i32_0 = arith.constant 0 : i32
    %c0_i32_1 = arith.constant 0 : i32
    return %c0_i32, %c0_i32_0 : i32, i32
  }
  func.func @transform_7(%arg0: i32) -> (i32, i32) {
    %c0_i32 = arith.constant 0 : i32
    %c0_i32_0 = arith.constant 0 : i32
    return %arg0, %c0_i32 : i32, i32
  }
}

</mosaic_0001>

<bundles_post_ra>
// kernel: tpu_custom_call.1
= control target key start
LH: loop header
LB: loop body
LE: loop exit
PB: predicated region body
PF: predicated region fallthrough
CT: control target
= control target key end

     0   :  { %s2110_s0 = inlined_call_operand.hbm [shape: f32[8,8], index: 0, kind: input, shape index: {}]   ;;  %s2111_s1 = inlined_call_operand.hbm [shape: f32[8,512], index: 1, kind: input, shape index: {}]   ;;  %s2112_s2 = inlined_call_operand.hbm [shape: f32[1,512], index: 2, kind: input, shape index: {}]   ;;  %s2113_s3 = inlined_call_operand.hbm [shape: bf16[512,512], index: 3, kind: input, shape index: {}]   ;;  %s2114_s4 = inlined_call_operand.vmem [shape: f32[1,512], index: 4, kind: input, shape index: {}]   ;;  %s2115_s5 = inlined_call_operand.hbm [shape: bf16[1,512], index: 5, kind: input, shape index: {}]   ;;  %s2116_s6 = inlined_call_operand.<no memory space> [shape: f32[1,1], index: 6, kind: input, shape index: {}]   ;;  %s2117_s7 = inlined_call_operand.vmem [shape: f32[8,1], index: 7, kind: output, shape index: {}]  }
   0x1   :  { %v12_v0 = vstv %s2116_s6 }
   0x2   :  { %13 = vst [vmem:[#allocation2] sm:$0x1] %v12_v0 }
   0x3   :  { %14 = vsyncpa [#allocation4], 0 }
   0x4   :  { %15 = vsyncpa [#allocation6], 0  ;;  %s33_s28 = sshll.u32 %s2111_s1, 4  ;;  %s34_s28 = int_to_ptr.hbm [resolvable:$true] %s33_s28 }
   0x5   :  { %16 = vsyncpa [#allocation9], 0  ;;  %s2011_s29 = smov [#allocation5]   ;;  %s54_s10 = sshll.u32 %s2113_s3, 4  ;;  %s55_s10 = int_to_ptr.hbm [resolvable:$true] %s54_s10 }
   0x6   :  { %s35_s30 = sshll.u32 %s2011_s29, 4  ;;  %s2012_s11 = smov [#allocation8]   ;;  %s36_s30 = int_to_ptr.vmem [resolvable:$true] %s35_s30 }
   0x7   :  { %38 = dma.hbm_to_vmem [thread:$0]  %s34_s28, 512, %s36_s30, [#allocation6]  }
   0x8   :  { %s56_s6 = sshll.u32 %s2012_s11, 4  ;;  %s2013_s12 = smov 256   ;;  %s57_s6 = int_to_ptr.vmem [resolvable:$true] %s56_s6 }
   0x9   :  { %s2014_s13 = smov 16   ;;  %s22_s1 = sshll.u32 %s2110_s0, 4  ;;  %s23_s1 = int_to_ptr.hbm [resolvable:$true] %s22_s1 }
   0xa   :  { %62 = dma.hbm_to_vmem [thread:$0]  %s55_s10, 16384, %s57_s6, [#allocation9], %s2013_s12, %s2013_s12, %s2014_s13  }
   0xb   :  { %s2015_s16 = smov [#allocation3]   ;;  %s44_s3 = sshll.u32 %s2112_s2, 4  ;;  %s45_s3 = int_to_ptr.hbm [resolvable:$true] %s44_s3 }
   0xc   :  { %s24_s17 = sshll.u32 %s2015_s16, 4  ;;  %s2016_s20 = smov [#allocation7]   ;;  %s25_s17 = int_to_ptr.vmem [resolvable:$true] %s24_s17 }
   0xd   :  { %27 = dma.hbm_to_vmem [thread:$0]  %s23_s1, 128, %s25_s17, [#allocation4]  }
   0xe   :  { %s46_s21 = sshll.u32 %s2016_s20, 4  ;;  %s70_s24 = sshll.u32 %s2115_s5, 4  ;;  %s47_s21 = int_to_ptr.vmem [resolvable:$true] %s46_s21  ;;  %s71_s24 = int_to_ptr.hbm [resolvable:$true] %s70_s24 }
   0xf   :  { %49 = dma.hbm_to_vmem [thread:$0]  %s45_s3, 64, %s47_s21, [#allocation6]  }
  0x10   :  { %s2017_s0 = smov [#allocation10]  }
  0x11   :  { %s72_s25 = sshll.u32 %s2017_s0, 4  ;;  %s73_s25 = int_to_ptr.vmem [resolvable:$true] %s72_s25 }
  0x12   :  { %75 = dma.hbm_to_vmem [thread:$0]  %s71_s24, 64, %s73_s25, [#allocation9]  }
  0x13   :  { %2005 = dma.done.wait [#allocation4], 128  }
  0x14   :  { %2006 = vsyncadd [#allocation4], 4294967168 }
  0x15   :  { %2007 = dma.done.wait [#allocation6], 576  }
  0x16   :  { %2008 = vsyncadd [#allocation6], 4294966720 }
  0x17   :  { %2009 = dma.done.wait [#allocation9], 16448  }
  0x18   :  { %2010 = vsyncadd [#allocation9], 4294950848  ;;  %v99_v1 = vld [vmem:[#allocation5] sm:$0xff]  ;;  %v100_v2 = vld [vmem:[#allocation5 + $0x8] sm:$0xff]  ;;  %vm113_vm0 = vcmask 64512   ;;  %vm1224_vm1 = vcmask 7168  }
  0x19   :  { %v101_v3 = vld [vmem:[#allocation5 + $0x10] sm:$0xff]  ;;  %132 = vmatpush.msra.mxu0 %v99_v1  ;;  %152 = vmatpush.msra.mxu1 %v100_v2  ;;  %v102_v4 = vld [vmem:[#allocation5 + $0x18] sm:$0xff]  ;;  %v1351_v6 = vld [vmem:[#allocation8 + $0xe0] sm:$0xf] }
  0x1a   :  { %v98_v5 = vld [vmem:[#allocation3] sm:$0xff]  ;;  %172 = vmatpush.msra.mxu2 %v101_v3  ;;  %192 = vmatpush.msra.mxu3 %v102_v4  ;;  %v1779_v7 = vld [vmem:[#allocation8 + $0xec] sm:$0xf0]  ;;  %v1479_v8 = vld [vmem:[#allocation8 + $0x1e0] sm:$0xf] }
  0x1b   :  { %v1811_v9 = vld [vmem:[#allocation8 + $0x1ec] sm:$0xf0]  ;;  %1233 = vmatmul.msk.f32.vlgmr.msra.gmra.mxu0 %vm113_vm0, %v98_v5  ;;  %1234 = vmatmul.msk.f32.vlgmr.msra.gmra.mxu1 %vm113_vm0, %v98_v5  ;;  %v1352_v10 = vor.u32 %v1779_v7, %v1351_v6  ;;  %v1335_v12 = vld [vmem:[#allocation8 + $0xc0] sm:$0xf] }
  0x1c   :  { %v1480_v11 = vor.u32 %v1811_v9, %v1479_v8  ;;  %v1775_v13 = vld [vmem:[#allocation8 + $0xcc] sm:$0xf0]  ;;  %v1463_v14 = vld [vmem:[#allocation8 + $0x1c0] sm:$0xf]  ;;  %1235 = vmatmul.msk.f32.vlgmr.msra.gmra.mxu2 %vm113_vm0, %v98_v5  ;;  %1236 = vmatmul.msk.f32.vlgmr.msra.gmra.mxu3 %vm113_vm0, %v98_v5 }
  0x1d   :  { %v1807_v15 = vld [vmem:[#allocation8 + $0x1cc] sm:$0xf0]  ;;  %v1607_v16 = vld [vmem:[#allocation8 + $0x2e0] sm:$0xf]  ;;  %983 = vmatpush.bf16.msrb.mxu0 %v1352_v10  ;;  %v1336_v18 = vor.u32 %v1775_v13, %v1335_v12 }
  0x1e   :  { %v1843_v17 = vld [vmem:[#allocation8 + $0x2ec] sm:$0xf0]  ;;  %996 = vmatpush.bf16.msrb.mxu1 %v1480_v11  ;;  %v1464_v19 = vor.u32 %v1807_v15, %v1463_v14  ;;  %v1735_v21 = vld [vmem:[#allocation8 + $0x3e0] sm:$0xf] }
  0x1f   :  { %v1608_v20 = vor.u32 %v1843_v17, %v1607_v16  ;;  %v1875_v22 = vld [vmem:[#allocation8 + $0x3ec] sm:$0xf0]  ;;  %v1319_v23 = vld [vmem:[#allocation8 + $0xa0] sm:$0xf] }
  0x20   :  { %v1736_v24 = vor.u32 %v1875_v22, %v1735_v21  ;;  %v1771_v25 = vld [vmem:[#allocation8 + $0xac] sm:$0xf0]  ;;  %v1447_v26 = vld [vmem:[#allocation8 + $0x1a0] sm:$0xf] }
  0x21   :  { %v1803_v27 = vld [vmem:[#allocation8 + $0x1ac] sm:$0xf0]  ;;  %1009 = vmatpush.bf16.msrb.mxu2 %v1608_v20  ;;  %v1591_v28 = vld [vmem:[#allocation8 + $0x2c0] sm:$0xf]  ;;  %984 = vmatpush.bf16.msrb.mxu0 %v1336_v18  ;;  %v1320_v35 = vor.u32 %v1771_v25, %v1319_v23 }
  0x22   :  { %v1839_v29 = vld [vmem:[#allocation8 + $0x2cc] sm:$0xf0]  ;;  %v1719_v30 = vld [vmem:[#allocation8 + $0x3c0] sm:$0xf]  ;;  %1022 = vmatpush.bf16.msrb.mxu3 %v1736_v24  ;;  %997 = vmatpush.bf16.msrb.mxu1 %v1464_v19  ;;  %v1448_v36 = vor.u32 %v1803_v27, %v1447_v26 }
  0x23   :  { %v1592_v31 = vor.u32 %v1839_v29, %v1591_v28  ;;  %v1871_v32 = vld [vmem:[#allocation8 + $0x3cc] sm:$0xf0]  ;;  %v1303_v33 = vld [vmem:[#allocation8 + $0x80] sm:$0xf]  ;;  %v1777_v28 = vld [vmem:[#allocation8 + $0xe4] sm:$0xf] }
  0x24   :  { %v1767_v34 = vld [vmem:[#allocation8 + $0x8c] sm:$0xf0]  ;;  %v1720_v37 = vor.u32 %v1871_v32, %v1719_v30  ;;  %v1431_v38 = vld [vmem:[#allocation8 + $0x180] sm:$0xf]  ;;  %v1353_v29 = vld [vmem:[#allocation8 + $0xf0] sm:$0xf0] }
  0x25   :  { %v1799_v39 = vld [vmem:[#allocation8 + $0x18c] sm:$0xf0]  ;;  %v1575_v40 = vld [vmem:[#allocation8 + $0x2a0] sm:$0xf]  ;;  %1010 = vmatpush.bf16.msrb.mxu2 %v1592_v31  ;;  %985 = vmatpush.bf16.msrb.mxu0 %v1320_v35  ;;  %v1304_v48 = vor.u32 %v1767_v34, %v1303_v33  ;;  %v1809_v30 = vld [vmem:[#allocation8 + $0x1e4] sm:$0xf] }
  0x26   :  { %v1835_v41 = vld [vmem:[#allocation8 + $0x2ac] sm:$0xf0]  ;;  %v1703_v42 = vld [vmem:[#allocation8 + $0x3a0] sm:$0xf]  ;;  %1023 = vmatpush.bf16.msrb.mxu3 %v1720_v37  ;;  %998 = vmatpush.bf16.msrb.mxu1 %v1448_v36  ;;  %v1432_v49 = vor.u32 %v1799_v39, %v1431_v38  ;;  %v1481_v31 = vld [vmem:[#allocation8 + $0x1f0] sm:$0xf0] }
  0x27   :  { %v1867_v43 = vld [vmem:[#allocation8 + $0x3ac] sm:$0xf0]  ;;  %v1576_v44 = vor.u32 %v1835_v41, %v1575_v40  ;;  %v1559_v46 = vld [vmem:[#allocation8 + $0x280] sm:$0xf]  ;;  %v1841_v40 = vld [vmem:[#allocation8 + $0x2e4] sm:$0xf] }
  0x28   :  { %v1704_v45 = vor.u32 %v1867_v43, %v1703_v42  ;;  %v1831_v47 = vld [vmem:[#allocation8 + $0x28c] sm:$0xf0]  ;;  %v1287_v50 = vld [vmem:[#allocation8 + $0x60] sm:$0xf]  ;;  %v1609_v41 = vld [vmem:[#allocation8 + $0x2f0] sm:$0xf0]  ;;  %v1356_v42 = vor.u32 %v1777_v28, %v1353_v29  ;;  %v1484_v43 = vor.u32 %v1809_v30, %v1481_v31 }
  0x29   :  { %v1687_v51 = vld [vmem:[#allocation8 + $0x380] sm:$0xf]  ;;  %v1863_v52 = vld [vmem:[#allocation8 + $0x38c] sm:$0xf0]  ;;  %1011 = vmatpush.bf16.msrb.mxu2 %v1576_v44  ;;  %v1560_v56 = vor.u32 %v1831_v47, %v1559_v46  ;;  %986 = vmatpush.bf16.msrb.mxu0 %v1304_v48  ;;  %v1773_v44 = vld [vmem:[#allocation8 + $0xc4] sm:$0xf] }
  0x2a   :  { %v1763_v53 = vld [vmem:[#allocation8 + $0x6c] sm:$0xf0]  ;;  %v1415_v54 = vld [vmem:[#allocation8 + $0x160] sm:$0xf]  ;;  %1024 = vmatpush.bf16.msrb.mxu3 %v1704_v45  ;;  %v1688_v57 = vor.u32 %v1863_v52, %v1687_v51  ;;  %999 = vmatpush.bf16.msrb.mxu1 %v1432_v49  ;;  %v1873_v45 = vld [vmem:[#allocation8 + $0x3e4] sm:$0xf]  ;;  %v1612_v52 = vor.u32 %v1841_v40, %v1609_v41 }
  0x2b   :  { %v1795_v55 = vld [vmem:[#allocation8 + $0x16c] sm:$0xf0]  ;;  %v1543_v58 = vld [vmem:[#allocation8 + $0x260] sm:$0xf]  ;;  %v1288_v60 = vor.u32 %v1763_v53, %v1287_v50  ;;  %v1737_v46 = vld [vmem:[#allocation8 + $0x3f0] sm:$0xf0] }
  0x2c   :  { %v1827_v59 = vld [vmem:[#allocation8 + $0x26c] sm:$0xf0]  ;;  %v1416_v61 = vor.u32 %v1795_v55, %v1415_v54  ;;  %v1271_v62 = vld [vmem:[#allocation8 + $0x40] sm:$0xf]  ;;  %v1337_v47 = vld [vmem:[#allocation8 + $0xd0] sm:$0xf0]  ;;  %v1740_v53 = vor.u32 %v1873_v45, %v1737_v46 }
  0x2d   :  { %v1671_v63 = vld [vmem:[#allocation8 + $0x360] sm:$0xf]  ;;  %v1859_v0 = vld [vmem:[#allocation8 + $0x36c] sm:$0xf0]  ;;  %1012 = vmatpush.bf16.msrb.mxu2 %v1560_v56  ;;  %v1544_v4 = vor.u32 %v1827_v59, %v1543_v58  ;;  %987 = vmatpush.bf16.msrb.mxu0 %v1288_v60  ;;  %v1805_v48 = vld [vmem:[#allocation8 + $0x1c4] sm:$0xf]  ;;  %v1340_v56 = vor.u32 %v1773_v44, %v1337_v47 }
  0x2e   :  { %v1759_v1 = vld [vmem:[#allocation8 + $0x4c] sm:$0xf0]  ;;  %v1399_v2 = vld [vmem:[#allocation8 + $0x140] sm:$0xf]  ;;  %1025 = vmatpush.bf16.msrb.mxu3 %v1688_v57  ;;  %v1672_v5 = vor.u32 %v1859_v0, %v1671_v63  ;;  %1000 = vmatpush.bf16.msrb.mxu1 %v1416_v61  ;;  %v1465_v49 = vld [vmem:[#allocation8 + $0x1d0] sm:$0xf0] }
  0x2f   :  { %v1791_v3 = vld [vmem:[#allocation8 + $0x14c] sm:$0xf0]  ;;  %v1527_v6 = vld [vmem:[#allocation8 + $0x240] sm:$0xf]  ;;  %v1272_v8 = vor.u32 %v1759_v1, %v1271_v62  ;;  %v1837_v54 = vld [vmem:[#allocation8 + $0x2c4] sm:$0xf]  ;;  %v1468_v57 = vor.u32 %v1805_v48, %v1465_v49 }
  0x30   :  { %v1823_v7 = vld [vmem:[#allocation8 + $0x24c] sm:$0xf0]  ;;  %v1400_v9 = vor.u32 %v1791_v3, %v1399_v2  ;;  %v1255_v10 = vld [vmem:[#allocation8 + $0x20] sm:$0xf]  ;;  %v1593_v55 = vld [vmem:[#allocation8 + $0x2d0] sm:$0xf0] }
  0x31   :  { %v1655_v11 = vld [vmem:[#allocation8 + $0x340] sm:$0xf]  ;;  %v1855_v12 = vld [vmem:[#allocation8 + $0x34c] sm:$0xf0]  ;;  %1013 = vmatpush.bf16.msrb.mxu2 %v1544_v4  ;;  %v1528_v16 = vor.u32 %v1823_v7, %v1527_v6  ;;  %988 = vmatpush.bf16.msrb.mxu0 %v1272_v8  ;;  %v1769_v58 = vld [vmem:[#allocation8 + $0xa4] sm:$0xf]  ;;  %v1596_v0 = vor.u32 %v1837_v54, %v1593_v55 }
  0x32   :  { %v1755_v13 = vld [vmem:[#allocation8 + $0x2c] sm:$0xf0]  ;;  %v1383_v14 = vld [vmem:[#allocation8 + $0x120] sm:$0xf]  ;;  %1026 = vmatpush.bf16.msrb.mxu3 %v1672_v5  ;;  %v1656_v17 = vor.u32 %v1855_v12, %v1655_v11  ;;  %1001 = vmatpush.bf16.msrb.mxu1 %v1400_v9  ;;  %v1869_v59 = vld [vmem:[#allocation8 + $0x3c4] sm:$0xf] }
  0x33   :  { %v1787_v15 = vld [vmem:[#allocation8 + $0x12c] sm:$0xf0]  ;;  %v1239_v18 = vld [vmem:[#allocation8] sm:$0xf]  ;;  %v1256_v21 = vor.u32 %v1755_v13, %v1255_v10  ;;  %v1721_v60 = vld [vmem:[#allocation8 + $0x3d0] sm:$0xf0] }
  0x34   :  { %v1511_v19 = vld [vmem:[#allocation8 + $0x220] sm:$0xf]  ;;  %v1819_v20 = vld [vmem:[#allocation8 + $0x22c] sm:$0xf0]  ;;  %v1384_v22 = vor.u32 %v1787_v15, %v1383_v14  ;;  %v1321_v61 = vld [vmem:[#allocation8 + $0xb0] sm:$0xf0]  ;;  %v1724_v1 = vor.u32 %v1869_v59, %v1721_v60 }
  0x35   :  { %v1751_v23 = vld [vmem:[#allocation8 + $0xc] sm:$0xf0]  ;;  %v1639_v24 = vld [vmem:[#allocation8 + $0x320] sm:$0xf]  ;;  %1014 = vmatpush.bf16.msrb.mxu2 %v1528_v16  ;;  %v1512_v32 = vor.u32 %v1819_v20, %v1511_v19  ;;  %989 = vmatpush.bf16.msrb.mxu0 %v1256_v21  ;;  %v1801_v62 = vld [vmem:[#allocation8 + $0x1a4] sm:$0xf]  ;;  %v1324_v4 = vor.u32 %v1769_v58, %v1321_v61 }
  0x36   :  { %v1851_v25 = vld [vmem:[#allocation8 + $0x32c] sm:$0xf0]  ;;  %v1367_v26 = vld [vmem:[#allocation8 + $0x100] sm:$0xf]  ;;  %1027 = vmatpush.bf16.msrb.mxu3 %v1656_v17  ;;  %1002 = vmatpush.bf16.msrb.mxu1 %v1384_v22  ;;  %v1240_v37 = vor.u32 %v1751_v23, %v1239_v18  ;;  %v1449_v63 = vld [vmem:[#allocation8 + $0x1b0] sm:$0xf0] }
  0x37   :  { %v1783_v27 = vld [vmem:[#allocation8 + $0x10c] sm:$0xf0]  ;;  %v1640_v33 = vor.u32 %v1851_v25, %v1639_v24  ;;  %v1495_v34 = vld [vmem:[#allocation8 + $0x200] sm:$0xf]  ;;  %v1833_v2 = vld [vmem:[#allocation8 + $0x2a4] sm:$0xf]  ;;  %v1452_v5 = vor.u32 %v1801_v62, %v1449_v63 }
  0x38   :  { %v1815_v35 = vld [vmem:[#allocation8 + $0x20c] sm:$0xf0]  ;;  %v1623_v36 = vld [vmem:[#allocation8 + $0x300] sm:$0xf]  ;;  %v1368_v38 = vor.u32 %v1783_v27, %v1367_v26  ;;  %v1577_v3 = vld [vmem:[#allocation8 + $0x2b0] sm:$0xf0] }
  0x39   :  { %v1847_v39 = vld [vmem:[#allocation8 + $0x30c] sm:$0xf0]  ;;  %1015 = vmatpush.bf16.msrb.mxu2 %v1512_v32  ;;  %v1496_v50 = vor.u32 %v1815_v35, %v1495_v34  ;;  %990 = vmatpush.bf16.msrb.mxu0 %v1240_v37  ;;  %v1765_v6 = vld [vmem:[#allocation8 + $0x84] sm:$0xf]  ;;  %v1705_v8 = vld [vmem:[#allocation8 + $0x3b0] sm:$0xf0]  ;;  %v1580_v12 = vor.u32 %v1833_v2, %v1577_v3 }
  0x3a   :  { %1028 = vmatpush.bf16.msrb.mxu3 %v1640_v33  ;;  %v1624_v51 = vor.u32 %v1847_v39, %v1623_v36  ;;  %1003 = vmatpush.bf16.msrb.mxu1 %v1368_v38  ;;  %v1865_v7 = vld [vmem:[#allocation8 + $0x3a4] sm:$0xf]  ;;  %v1305_v9 = vld [vmem:[#allocation8 + $0x90] sm:$0xf0] }
  0x3b   :  { %v1797_v10 = vld [vmem:[#allocation8 + $0x184] sm:$0xf]  ;;  %v1433_v11 = vld [vmem:[#allocation8 + $0x190] sm:$0xf0]  ;;  %v1708_v13 = vor.u32 %v1865_v7, %v1705_v8  ;;  %v1308_v16 = vor.u32 %v1765_v6, %v1305_v9  ;;  %v103_v6 = vld [vmem:[#allocation7] sm:$0xf] }
  0x3c   :  { %v1829_v14 = vld [vmem:[#allocation8 + $0x284] sm:$0xf]  ;;  %v1561_v15 = vld [vmem:[#allocation8 + $0x290] sm:$0xf0]  ;;  %v1436_v17 = vor.u32 %v1797_v10, %v1433_v11  ;;  %v105_v7 = vperm.slane %v103_v6, 0  ;;  %v106_v8 = vperm.slane %v103_v6, 1 }
  0x3d   :  { %1035 = vmatpush.bf16.msra.mxu0 %v1356_v42  ;;  %1016 = vmatpush.bf16.msrb.mxu2 %v1496_v50  ;;  %v1761_v18 = vld [vmem:[#allocation8 + $0x64] sm:$0xf]  ;;  %v1689_v20 = vld [vmem:[#allocation8 + $0x390] sm:$0xf0]  ;;  %v1564_v24 = vor.u32 %v1829_v14, %v1561_v15  ;;  %v1359_v11 = vld [vmem:[#allocation8 + $0xe8] sm:$0xf] }
  0x3e   :  { %1048 = vmatpush.bf16.msra.mxu1 %v1484_v43  ;;  %1029 = vmatpush.bf16.msrb.mxu3 %v1624_v51  ;;  %v1861_v19 = vld [vmem:[#allocation8 + $0x384] sm:$0xf]  ;;  %v1289_v21 = vld [vmem:[#allocation8 + $0x70] sm:$0xf0]  ;;  %v1780_v14 = vld [vmem:[#allocation8 + $0xf4] sm:$0xf0] }
  0x3f   :  { %v1793_v22 = vld [vmem:[#allocation8 + $0x164] sm:$0xf]  ;;  %v1417_v23 = vld [vmem:[#allocation8 + $0x170] sm:$0xf0]  ;;  %v1692_v25 = vor.u32 %v1861_v19, %v1689_v20  ;;  %v1292_v26 = vor.u32 %v1761_v18, %v1289_v21  ;;  %v1487_v15 = vld [vmem:[#allocation8 + $0x1e8] sm:$0xf]  ;;  %v1360_v21 = vor.u32 %v1780_v14, %v1359_v11 }
  0x40   :  { %v1420_v27 = vor.u32 %v1793_v22, %v1417_v23  ;;  %v1757_v28 = vld [vmem:[#allocation8 + $0x44] sm:$0xf]  ;;  %v1273_v29 = vld [vmem:[#allocation8 + $0x50] sm:$0xf0]  ;;  %v107_v19 = vperm.slane %v103_v6, 2  ;;  %v108_v20 = vperm.slane %v103_v6, 3 }
  0x41   :  { %1061 = vmatpush.bf16.msra.mxu2 %v1612_v52  ;;  %1036 = vmatpush.bf16.msra.mxu0 %v1340_v56  ;;  %v1789_v30 = vld [vmem:[#allocation8 + $0x144] sm:$0xf]  ;;  %v1401_v31 = vld [vmem:[#allocation8 + $0x150] sm:$0xf0]  ;;  %v1276_v32 = vor.u32 %v1757_v28, %v1273_v29  ;;  %v1343_v23 = vld [vmem:[#allocation8 + $0xc8] sm:$0xf] }
  0x42   :  { %1074 = vmatpush.bf16.msra.mxu3 %v1740_v53  ;;  %1049 = vmatpush.bf16.msra.mxu1 %v1468_v57  ;;  %v1404_v33 = vor.u32 %v1789_v30, %v1401_v31  ;;  %v1825_v34 = vld [vmem:[#allocation8 + $0x264] sm:$0xf]  ;;  %v1545_v35 = vld [vmem:[#allocation8 + $0x270] sm:$0xf0]  ;;  %v1808_v28 = vld [vmem:[#allocation8 + $0x1d4] sm:$0xf0] }
  0x43   :  { %v1857_v36 = vld [vmem:[#allocation8 + $0x364] sm:$0xf]  ;;  %v1548_v37 = vor.u32 %v1825_v34, %v1545_v35  ;;  %v1673_v38 = vld [vmem:[#allocation8 + $0x370] sm:$0xf0]  ;;  %v1743_v34 = vld [vmem:[#allocation8 + $0x3e8] sm:$0xf] }
  0x44   :  { %v1676_v39 = vor.u32 %v1857_v36, %v1673_v38  ;;  %v1753_v40 = vld [vmem:[#allocation8 + $0x24] sm:$0xf]  ;;  %v1257_v41 = vld [vmem:[#allocation8 + $0x30] sm:$0xf0]  ;;  %v1876_v38 = vld [vmem:[#allocation8 + $0x3f4] sm:$0xf0] }
  0x45   :  { %1062 = vmatpush.bf16.msra.mxu2 %v1596_v0  ;;  %1037 = vmatpush.bf16.msra.mxu0 %v1324_v4  ;;  %v1260_v42 = vor.u32 %v1753_v40, %v1257_v41  ;;  %v1785_v43 = vld [vmem:[#allocation8 + $0x124] sm:$0xf]  ;;  %v1385_v44 = vld [vmem:[#allocation8 + $0x130] sm:$0xf0]  ;;  %v1772_v40 = vld [vmem:[#allocation8 + $0xb4] sm:$0xf0] }
  0x46   :  { %1075 = vmatpush.bf16.msra.mxu3 %v1724_v1  ;;  %1050 = vmatpush.bf16.msra.mxu1 %v1452_v5  ;;  %v1388_v45 = vor.u32 %v1785_v43, %v1385_v44  ;;  %v1821_v46 = vld [vmem:[#allocation8 + $0x244] sm:$0xf]  ;;  %v1529_v47 = vld [vmem:[#allocation8 + $0x250] sm:$0xf0]  ;;  %v1455_v41 = vld [vmem:[#allocation8 + $0x1a8] sm:$0xf] }
  0x47   :  { %v1853_v48 = vld [vmem:[#allocation8 + $0x344] sm:$0xf]  ;;  %v1532_v49 = vor.u32 %v1821_v46, %v1529_v47  ;;  %v1657_v50 = vld [vmem:[#allocation8 + $0x350] sm:$0xf0]  ;;  %v1744_v46 = vor.u32 %v1876_v38, %v1743_v34  ;;  %v1796_v6 = vld [vmem:[#allocation8 + $0x174] sm:$0xf0] }
  0x48   :  { %v1660_v51 = vor.u32 %v1853_v48, %v1657_v50  ;;  %v1749_v52 = vld [vmem:[#allocation8 + $0x4] sm:$0xf]  ;;  %v1241_v53 = vld [vmem:[#allocation8 + $0x10] sm:$0xf0]  ;;  %v1599_v48 = vld [vmem:[#allocation8 + $0x2c8] sm:$0xf] }
  0x49   :  { %1063 = vmatpush.bf16.msra.mxu2 %v1580_v12  ;;  %1038 = vmatpush.bf16.msra.mxu0 %v1308_v16  ;;  %v1781_v54 = vld [vmem:[#allocation8 + $0x104] sm:$0xf]  ;;  %v1244_v55 = vor.u32 %v1749_v52, %v1241_v53  ;;  %v1369_v56 = vld [vmem:[#allocation8 + $0x110] sm:$0xf0]  ;;  %v1812_v16 = vld [vmem:[#allocation8 + $0x1f4] sm:$0xf0] }
  0x4a   :  { %1076 = vmatpush.bf16.msra.mxu3 %v1708_v13  ;;  %1051 = vmatpush.bf16.msra.mxu1 %v1436_v17  ;;  %v1372_v57 = vor.u32 %v1781_v54, %v1369_v56  ;;  %v1817_v58 = vld [vmem:[#allocation8 + $0x224] sm:$0xf]  ;;  %v1513_v59 = vld [vmem:[#allocation8 + $0x230] sm:$0xf0]  ;;  %v1488_v22 = vor.u32 %v1812_v16, %v1487_v15  ;;  %v1727_v53 = vld [vmem:[#allocation8 + $0x3c8] sm:$0xf] }
  0x4b   :  { %v1516_v60 = vor.u32 %v1817_v58, %v1513_v59  ;;  %v1849_v61 = vld [vmem:[#allocation8 + $0x324] sm:$0xf]  ;;  %v1641_v62 = vld [vmem:[#allocation8 + $0x330] sm:$0xf0]  ;;  %v1872_v54 = vld [vmem:[#allocation8 + $0x3d4] sm:$0xf0] }
  0x4c   :  { %v1644_v63 = vor.u32 %v1849_v61, %v1641_v62  ;;  %v1813_v0 = vld [vmem:[#allocation8 + $0x204] sm:$0xf]  ;;  %v1497_v1 = vld [vmem:[#allocation8 + $0x210] sm:$0xf0]  ;;  %v1768_v56 = vld [vmem:[#allocation8 + $0x94] sm:$0xf0] }
  0x4d   :  { %1064 = vmatpush.bf16.msra.mxu2 %v1564_v24  ;;  %1039 = vmatpush.bf16.msra.mxu0 %v1292_v26  ;;  %v1500_v2 = vor.u32 %v1813_v0, %v1497_v1  ;;  %v1845_v3 = vld [vmem:[#allocation8 + $0x304] sm:$0xf]  ;;  %v1625_v4 = vld [vmem:[#allocation8 + $0x310] sm:$0xf0]  ;;  %v1776_v24 = vld [vmem:[#allocation8 + $0xd4] sm:$0xf0] }
  0x4e   :  { %1077 = vmatpush.bf16.msra.mxu3 %v1692_v25  ;;  %1052 = vmatpush.bf16.msra.mxu1 %v1420_v27  ;;  %v1628_v5 = vor.u32 %v1845_v3, %v1625_v4  ;;  %v1471_v27 = vld [vmem:[#allocation8 + $0x1c8] sm:$0xf]  ;;  %v1344_v31 = vor.u32 %v1776_v24, %v1343_v23  ;;  %v1800_v58 = vld [vmem:[#allocation8 + $0x194] sm:$0xf0] }
  0x4f   :  { %v1583_v61 = vld [vmem:[#allocation8 + $0x2a8] sm:$0xf]  ;;  %v1836_v0 = vld [vmem:[#allocation8 + $0x2b4] sm:$0xf0] }
  0x50   :  { %v1711_v1 = vld [vmem:[#allocation8 + $0x3a8] sm:$0xf]  ;;  %v1764_v4 = vld [vmem:[#allocation8 + $0x74] sm:$0xf0] }
  0x51   :  { %1040 = vmatpush.bf16.msra.mxu0 %v1276_v32  ;;  %1065 = vmatpush.bf16.msra.mxu2 %v1548_v37  ;;  %v1615_v32 = vld [vmem:[#allocation8 + $0x2e8] sm:$0xf]  ;;  %v1472_v37 = vor.u32 %v1808_v28, %v1471_v27  ;;  %v1760_v16 = vld [vmem:[#allocation8 + $0x54] sm:$0xf0] }
  0x52   :  { %1053 = vmatpush.bf16.msra.mxu1 %v1404_v33  ;;  %1078 = vmatpush.bf16.msra.mxu3 %v1676_v39  ;;  %v1844_v33 = vld [vmem:[#allocation8 + $0x2f4] sm:$0xf0]  ;;  %v1327_v39 = vld [vmem:[#allocation8 + $0xa8] sm:$0xf] }
  0x53   :  { %v1328_v47 = vor.u32 %v1772_v40, %v1327_v39  ;;  %v1295_v3 = vld [vmem:[#allocation8 + $0x68] sm:$0xf]  ;;  %v1860_v24 = vld [vmem:[#allocation8 + $0x374] sm:$0xf0] }
  0x54   :  { %v1695_v11 = vld [vmem:[#allocation8 + $0x388] sm:$0xf]  ;;  %v1856_v38 = vld [vmem:[#allocation8 + $0x354] sm:$0xf0] }
  0x55   :  { %1041 = vmatpush.bf16.msra.mxu0 %v1260_v42  ;;  %1066 = vmatpush.bf16.msra.mxu2 %v1532_v49  ;;  %v1804_v42 = vld [vmem:[#allocation8 + $0x1b4] sm:$0xf0]  ;;  %v1279_v15 = vld [vmem:[#allocation8 + $0x48] sm:$0xf] }
  0x56   :  { %1054 = vmatpush.bf16.msra.mxu1 %v1388_v45  ;;  %1079 = vmatpush.bf16.msra.mxu3 %v1660_v51  ;;  %v1616_v45 = vor.u32 %v1844_v33, %v1615_v32  ;;  %v1840_v49 = vld [vmem:[#allocation8 + $0x2d4] sm:$0xf0]  ;;  %v1456_v52 = vor.u32 %v1804_v42, %v1455_v41  ;;  %v1679_v23 = vld [vmem:[#allocation8 + $0x368] sm:$0xf]  ;;  %v1280_v27 = vor.u32 %v1760_v16, %v1279_v15  ;;  %v1329_v16 = vld [vmem:[#allocation8 + $0xb8] sm:$0xf0] }
  0x57   :  { %v1600_v59 = vor.u32 %v1840_v49, %v1599_v48  ;;  %v1788_v32 = vld [vmem:[#allocation8 + $0x134] sm:$0xf0]  ;;  %v1680_v34 = vor.u32 %v1860_v24, %v1679_v23  ;;  %v1247_v41 = vld [vmem:[#allocation8 + $0x8] sm:$0xf]  ;;  %v1810_v49 = vld [vmem:[#allocation8 + $0x1ec] sm:$0xf] }
  0x58   :  { %v1752_v42 = vld [vmem:[#allocation8 + $0x14] sm:$0xf0]  ;;  %v1870_v23 = vld [vmem:[#allocation8 + $0x3cc] sm:$0xf]  ;;  %v1729_v24 = vld [vmem:[#allocation8 + $0x3d8] sm:$0xf0] }
  0x59   :  { %1042 = vmatpush.bf16.msra.mxu0 %v1244_v55  ;;  %1067 = vmatpush.bf16.msra.mxu2 %v1516_v60  ;;  %v1311_v55 = vld [vmem:[#allocation8 + $0x88] sm:$0xf]  ;;  %v1728_v60 = vor.u32 %v1872_v54, %v1727_v53  ;;  %v1820_v54 = vld [vmem:[#allocation8 + $0x234] sm:$0xf0] }
  0x5a   :  { %1055 = vmatpush.bf16.msra.mxu1 %v1372_v57  ;;  %1080 = vmatpush.bf16.msra.mxu3 %v1644_v63  ;;  %v1439_v57 = vld [vmem:[#allocation8 + $0x188] sm:$0xf]  ;;  %v1312_v62 = vor.u32 %v1768_v56, %v1311_v55  ;;  %v1852_v56 = vld [vmem:[#allocation8 + $0x334] sm:$0xf0] }
  0x5b   :  { %v1440_v63 = vor.u32 %v1800_v58, %v1439_v57  ;;  %v1519_v53 = vld [vmem:[#allocation8 + $0x228] sm:$0xf]  ;;  %v1248_v57 = vor.u32 %v1752_v42, %v1247_v41  ;;  %v1762_v41 = vld [vmem:[#allocation8 + $0x6c] sm:$0xf]  ;;  %v1297_v42 = vld [vmem:[#allocation8 + $0x78] sm:$0xf0] }
  0x5c   :  { %v1647_v55 = vld [vmem:[#allocation8 + $0x328] sm:$0xf] }
  0x5d   :  { %1068 = vmatpush.bf16.msra.mxu2 %v1500_v2  ;;  %v1868_v2 = vld [vmem:[#allocation8 + $0x3b4] sm:$0xf0] }
  0x5e   :  { %1081 = vmatpush.bf16.msra.mxu3 %v1628_v5  ;;  %v1423_v5 = vld [vmem:[#allocation8 + $0x168] sm:$0xf] }
  0x5f   :  { %v1424_v14 = vor.u32 %v1796_v6, %v1423_v5  ;;  %v1631_v5 = vld [vmem:[#allocation8 + $0x308] sm:$0xf]  ;;  %v1848_v6 = vld [vmem:[#allocation8 + $0x314] sm:$0xf0] }
  0x60   :  { %v1632_v15 = vor.u32 %v1848_v6, %v1631_v5  ;;  %v1786_v5 = vld [vmem:[#allocation8 + $0x12c] sm:$0xf]  ;;  %v1393_v6 = vld [vmem:[#allocation8 + $0x138] sm:$0xf0] }
  0x98   :  { %v134_v9 = vpop.f32.mrf.mxu0  ;;  %v154_v10 = vpop.f32.mrf.mxu1 }
  0x99   :  { %v135_v12 = vadd.f32 %v134_v9, %v105_v7  ;;  %v155_v13 = vadd.f32 %v154_v10, %v106_v8  ;;  %v1584_v7 = vor.u32 %v1836_v0, %v1583_v61  ;;  %v1712_v8 = vor.u32 %v1868_v2, %v1711_v1  ;;  %v1567_v9 = vld [vmem:[#allocation8 + $0x288] sm:$0xf]  ;;  %v1832_v10 = vld [vmem:[#allocation8 + $0x294] sm:$0xf0]  ;;  %v1774_v61 = vld [vmem:[#allocation8 + $0xcc] sm:$0xf] }
  0x9a   :  { %v1520_v0 = vor.u32 %v1820_v54, %v1519_v53  ;;  %v1648_v1 = vor.u32 %v1852_v56, %v1647_v55  ;;  %v1473_v2 = vld [vmem:[#allocation8 + $0x1d8] sm:$0xf0]  ;;  %v1300_v53 = vor.u32 %v1762_v41, %v1297_v42  ;;  %v1758_v55 = vld [vmem:[#allocation8 + $0x4c] sm:$0xf] }
  0x9b   :  { %v197_v17 = vmax.f32 %v135_v12, 0.0  ;;  %v198_v18 = vmax.f32 %v155_v13, 0.0  ;;  %v1864_v12 = vld [vmem:[#allocation8 + $0x394] sm:$0xf0]  ;;  %v1296_v13 = vor.u32 %v1764_v4, %v1295_v3  ;;  %v1503_v3 = vld [vmem:[#allocation8 + $0x208] sm:$0xf] }
  0x9c   :  { %v1816_v4 = vld [vmem:[#allocation8 + $0x214] sm:$0xf0]  ;;  %v1281_v56 = vld [vmem:[#allocation8 + $0x58] sm:$0xf0] }
  0x9d   :  { %v2080_v25 = vpack.c.bf16 %v197_v17, %v197_v17  ;;  %v2082_v26 = vpack.c.bf16 %v198_v18, %v198_v18  ;;  %v1407_v17 = vld [vmem:[#allocation8 + $0x148] sm:$0xf]  ;;  %v1792_v18 = vld [vmem:[#allocation8 + $0x154] sm:$0xf0] }
  0x9e   :  { %v1408_v28 = vor.u32 %v1792_v18, %v1407_v17  ;;  %v1802_v17 = vld [vmem:[#allocation8 + $0x1ac] sm:$0xf]  ;;  %v1457_v18 = vld [vmem:[#allocation8 + $0x1b8] sm:$0xf0] }
  0x9f   :  { %v174_v29 = vpop.f32.mrf.mxu2  ;;  %v194_v30 = vpop.f32.mrf.mxu3  ;;  %991 = vmatmul.bf16.vlgmr.msrb.gmra.mxu0 %v2080_v25  ;;  %1004 = vmatmul.bf16.vlgmr.msrb.gmra.mxu1 %v2082_v26 }
  0xa0   :  { %v175_v35 = vadd.f32 %v174_v29, %v107_v19  ;;  %v195_v36 = vadd.f32 %v194_v30, %v108_v20  ;;  %1087 = vmatpush.bf16.msrb.mxu0 %v1360_v21  ;;  %1100 = vmatpush.bf16.msrb.mxu1 %v1488_v22  ;;  %v1568_v19 = vor.u32 %v1832_v10, %v1567_v9  ;;  %v1551_v21 = vld [vmem:[#allocation8 + $0x268] sm:$0xf]  ;;  %v1828_v22 = vld [vmem:[#allocation8 + $0x274] sm:$0xf0]  ;;  %v1874_v9 = vld [vmem:[#allocation8 + $0x3ec] sm:$0xf] }
  0xa1   :  { %v1696_v20 = vor.u32 %v1864_v12, %v1695_v11  ;;  %v1263_v29 = vld [vmem:[#allocation8 + $0x28] sm:$0xf]  ;;  %v1756_v30 = vld [vmem:[#allocation8 + $0x34] sm:$0xf0]  ;;  %v1552_v33 = vor.u32 %v1828_v22, %v1551_v21  ;;  %v1745_v10 = vld [vmem:[#allocation8 + $0x3f8] sm:$0xf0] }
  0xa2   :  { %v199_v43 = vmax.f32 %v175_v35, 0.0  ;;  %v200_v44 = vmax.f32 %v195_v36, 0.0  ;;  %v1535_v35 = vld [vmem:[#allocation8 + $0x248] sm:$0xf]  ;;  %v1824_v36 = vld [vmem:[#allocation8 + $0x254] sm:$0xf0]  ;;  %v1264_v39 = vor.u32 %v1756_v30, %v1263_v29 }
  0xa3   :  { %v1838_v21 = vld [vmem:[#allocation8 + $0x2cc] sm:$0xf]  ;;  %v1601_v22 = vld [vmem:[#allocation8 + $0x2d8] sm:$0xf0] }
  0xa4   :  { %v2086_v50 = vpack.c.bf16 %v199_v43, %v199_v43  ;;  %v2088_v51 = vpack.c.bf16 %v200_v44, %v200_v44  ;;  %1088 = vmatpush.bf16.msrb.mxu0 %v1344_v31  ;;  %1101 = vmatpush.bf16.msrb.mxu1 %v1472_v37  ;;  %v1391_v31 = vld [vmem:[#allocation8 + $0x128] sm:$0xf]  ;;  %v1784_v44 = vld [vmem:[#allocation8 + $0x114] sm:$0xf0]  ;;  %v1766_v29 = vld [vmem:[#allocation8 + $0x8c] sm:$0xf] }
  0xa5   :  { %v1663_v37 = vld [vmem:[#allocation8 + $0x348] sm:$0xf]  ;;  %v1392_v40 = vor.u32 %v1788_v32, %v1391_v31  ;;  %v1313_v30 = vld [vmem:[#allocation8 + $0x98] sm:$0xf0]  ;;  %v1798_v31 = vld [vmem:[#allocation8 + $0x18c] sm:$0xf] }
  0xa6   :  { %1017 = vmatmul.bf16.vlgmr.msrb.gmra.mxu2 %v2086_v50  ;;  %1030 = vmatmul.bf16.vlgmr.msrb.gmra.mxu3 %v2088_v51  ;;  %v1375_v43 = vld [vmem:[#allocation8 + $0x108] sm:$0xf]  ;;  %v1664_v48 = vor.u32 %v1856_v38, %v1663_v37  ;;  %v1441_v32 = vld [vmem:[#allocation8 + $0x198] sm:$0xf0]  ;;  %v1866_v37 = vld [vmem:[#allocation8 + $0x3ac] sm:$0xf] }
  0xa7   :  { %1113 = vmatpush.bf16.msrb.mxu2 %v1616_v45  ;;  %1126 = vmatpush.bf16.msrb.mxu3 %v1744_v46  ;;  %v1778_v45 = vld [vmem:[#allocation8 + $0xec] sm:$0xf]  ;;  %v1361_v46 = vld [vmem:[#allocation8 + $0xf8] sm:$0xf0]  ;;  %v1376_v58 = vor.u32 %v1784_v44, %v1375_v43 }
  0xa8   :  { %1089 = vmatpush.bf16.msrb.mxu0 %v1328_v47  ;;  %1102 = vmatpush.bf16.msrb.mxu1 %v1456_v52  ;;  %v1536_v47 = vor.u32 %v1824_v36, %v1535_v35  ;;  %v1489_v52 = vld [vmem:[#allocation8 + $0x1f8] sm:$0xf0]  ;;  %v1834_v35 = vld [vmem:[#allocation8 + $0x2ac] sm:$0xf] }
  0xa9   :  { %v1585_v36 = vld [vmem:[#allocation8 + $0x2b8] sm:$0xf0]  ;;  %v1794_v43 = vld [vmem:[#allocation8 + $0x16c] sm:$0xf] }
  0xaa   :  { %v1713_v38 = vld [vmem:[#allocation8 + $0x3b8] sm:$0xf0] }
  0xab   :  { %1114 = vmatpush.bf16.msrb.mxu2 %v1600_v59  ;;  %1127 = vmatpush.bf16.msrb.mxu3 %v1728_v60  ;;  %v1364_v59 = vor.u32 %v1778_v45, %v1361_v46  ;;  %v1492_v60 = vor.u32 %v1810_v49, %v1489_v52  ;;  %v1425_v44 = vld [vmem:[#allocation8 + $0x178] sm:$0xf0]  ;;  %v1588_v45 = vor.u32 %v1834_v35, %v1585_v36  ;;  %v1862_v49 = vld [vmem:[#allocation8 + $0x38c] sm:$0xf] }
  0xac   :  { %1090 = vmatpush.bf16.msrb.mxu0 %v1312_v62  ;;  %1103 = vmatpush.bf16.msrb.mxu1 %v1440_v63  ;;  %v1345_v62 = vld [vmem:[#allocation8 + $0xd8] sm:$0xf0]  ;;  %v1806_v63 = vld [vmem:[#allocation8 + $0x1cc] sm:$0xf]  ;;  %v1716_v46 = vor.u32 %v1866_v37, %v1713_v38  ;;  %v1428_v54 = vor.u32 %v1794_v43, %v1425_v44  ;;  %v333_v37 = vld [vmem:[%s2114_s4] sm:$0xf] }
  0xad   :  { %v1348_v11 = vor.u32 %v1774_v61, %v1345_v62  ;;  %v1476_v12 = vor.u32 %v1806_v63, %v1473_v2  ;;  %v1697_v52 = vld [vmem:[#allocation8 + $0x398] sm:$0xf0]  ;;  %v1826_v61 = vld [vmem:[#allocation8 + $0x26c] sm:$0xf]  ;;  %v335_v38 = vperm.slane %v333_v37, 0 }
  0xae   :  { %v1553_v62 = vld [vmem:[#allocation8 + $0x278] sm:$0xf0]  ;;  %v1858_v63 = vld [vmem:[#allocation8 + $0x36c] sm:$0xf] }
  0xaf   :  { %1115 = vmatpush.bf16.msrb.mxu2 %v1584_v7  ;;  %1128 = vmatpush.bf16.msrb.mxu3 %v1712_v8  ;;  %v1842_v7 = vld [vmem:[#allocation8 + $0x2ec] sm:$0xf]  ;;  %v1617_v8 = vld [vmem:[#allocation8 + $0x2f8] sm:$0xf0] }
  0xb0   :  { %1043 = vmatmul.bf16.vlgmr.msra.gmra.mxu0 %v2080_v25  ;;  %1056 = vmatmul.bf16.vlgmr.msra.gmra.mxu1 %v2082_v26 }
  0xb1   :  { %1091 = vmatpush.bf16.msrb.mxu0 %v1296_v13  ;;  %1104 = vmatpush.bf16.msrb.mxu1 %v1424_v14  ;;  %v1770_v13 = vld [vmem:[#allocation8 + $0xac] sm:$0xf]  ;;  %v1504_v14 = vor.u32 %v1816_v4, %v1503_v3  ;;  %v1265_v4 = vld [vmem:[#allocation8 + $0x38] sm:$0xf0] }
  0xb2   :  { %v1754_v3 = vld [vmem:[#allocation8 + $0x2c] sm:$0xf] }
  0xb3   :  { %1116 = vmatpush.bf16.msrb.mxu2 %v1568_v19  ;;  %1129 = vmatpush.bf16.msrb.mxu3 %v1696_v20  ;;  %v1620_v19 = vor.u32 %v1842_v7, %v1617_v8  ;;  %v1748_v20 = vor.u32 %v1874_v9, %v1745_v10  ;;  %v1556_v7 = vor.u32 %v1826_v61, %v1553_v62  ;;  %v1822_v9 = vld [vmem:[#allocation8 + $0x24c] sm:$0xf]  ;;  %v1537_v10 = vld [vmem:[#allocation8 + $0x258] sm:$0xf0]  ;;  %v336_v61 = vperm.slane %v333_v37, 1 }
  0xb5   :  { %1092 = vmatpush.bf16.msrb.mxu0 %v1280_v27  ;;  %1105 = vmatpush.bf16.msrb.mxu1 %v1408_v28  ;;  %v1332_v27 = vor.u32 %v1770_v13, %v1329_v16  ;;  %v1460_v28 = vor.u32 %v1802_v17, %v1457_v18  ;;  %v1268_v13 = vor.u32 %v1754_v3, %v1265_v4  ;;  %v1249_v16 = vld [vmem:[#allocation8 + $0x18] sm:$0xf0]  ;;  %v1782_v17 = vld [vmem:[#allocation8 + $0x10c] sm:$0xf]  ;;  %v1195_v3 = vld [vmem:[#allocation10] sm:$0xf] }
  0xb6   :  { %1069 = vmatmul.bf16.vlgmr.msra.gmra.mxu2 %v2086_v50  ;;  %1082 = vmatmul.bf16.vlgmr.msra.gmra.mxu3 %v2088_v51  ;;  %v1377_v18 = vld [vmem:[#allocation8 + $0x118] sm:$0xf0] }
  0xb7   :  { %1117 = vmatpush.bf16.msrb.mxu2 %v1552_v33  ;;  %1130 = vmatpush.bf16.msrb.mxu3 %v1680_v34  ;;  %v1604_v33 = vor.u32 %v1838_v21, %v1601_v22  ;;  %v1732_v34 = vor.u32 %v1870_v23, %v1729_v24  ;;  %v1818_v21 = vld [vmem:[#allocation8 + $0x22c] sm:$0xf]  ;;  %v1521_v22 = vld [vmem:[#allocation8 + $0x238] sm:$0xf0] }
  0xb8   :  { %v1850_v23 = vld [vmem:[#allocation8 + $0x32c] sm:$0xf]  ;;  %v1649_v24 = vld [vmem:[#allocation8 + $0x338] sm:$0xf0] }
  0xb9   :  { %1093 = vmatpush.bf16.msrb.mxu0 %v1264_v39  ;;  %1106 = vmatpush.bf16.msrb.mxu1 %v1392_v40  ;;  %v1316_v39 = vor.u32 %v1766_v29, %v1313_v30  ;;  %v1444_v40 = vor.u32 %v1798_v31, %v1441_v32  ;;  %v1524_v29 = vor.u32 %v1818_v21, %v1521_v22  ;;  %v1814_v31 = vld [vmem:[#allocation8 + $0x20c] sm:$0xf]  ;;  %v1505_v32 = vld [vmem:[#allocation8 + $0x218] sm:$0xf0] }
  0xba   :  { %v1652_v30 = vor.u32 %v1850_v23, %v1649_v24  ;;  %v1508_v35 = vor.u32 %v1814_v31, %v1505_v32 }
  0xbb   :  { %1118 = vmatpush.bf16.msrb.mxu2 %v1536_v47  ;;  %1131 = vmatpush.bf16.msrb.mxu3 %v1664_v48  ;;  %v1830_v47 = vld [vmem:[#allocation8 + $0x28c] sm:$0xf]  ;;  %v1569_v48 = vld [vmem:[#allocation8 + $0x298] sm:$0xf0] }
  0xbd   :  { %1094 = vmatpush.bf16.msrb.mxu0 %v1248_v57  ;;  %1107 = vmatpush.bf16.msrb.mxu1 %v1376_v58  ;;  %v1790_v57 = vld [vmem:[#allocation8 + $0x14c] sm:$0xf]  ;;  %v1409_v58 = vld [vmem:[#allocation8 + $0x158] sm:$0xf0] }
  0xbe   :  { %v1412_v2 = vor.u32 %v1790_v57, %v1409_v58 }
  0xbf   :  { %1119 = vmatpush.bf16.msrb.mxu2 %v1520_v0  ;;  %1132 = vmatpush.bf16.msrb.mxu3 %v1648_v1  ;;  %v1681_v0 = vld [vmem:[#allocation8 + $0x378] sm:$0xf0]  ;;  %v1284_v1 = vor.u32 %v1758_v55, %v1281_v56 }
  0xc0   :  { %1095 = vmatmul.bf16.vlgmr.msrb.gmra.mxu0 %v2080_v25  ;;  %1108 = vmatmul.bf16.vlgmr.msrb.gmra.mxu1 %v2082_v26  ;;  %v1684_v8 = vor.u32 %v1858_v63, %v1681_v0  ;;  %v337_v0 = vperm.slane %v333_v37, 2 }
  0xc1   :  { %1139 = vmatpush.bf16.msra.mxu0 %v1364_v59  ;;  %1152 = vmatpush.bf16.msra.mxu1 %v1492_v60  ;;  %v1572_v59 = vor.u32 %v1830_v47, %v1569_v48  ;;  %v1700_v60 = vor.u32 %v1862_v49, %v1697_v52 }
  0xc3   :  { %1120 = vmatpush.bf16.msrb.mxu2 %v1504_v14  ;;  %1133 = vmatpush.bf16.msrb.mxu3 %v1632_v15  ;;  %v1396_v14 = vor.u32 %v1786_v5, %v1393_v6  ;;  %v1750_v15 = vld [vmem:[#allocation8 + $0xc] sm:$0xf] }
  0xc5   :  { %1140 = vmatpush.bf16.msra.mxu0 %v1348_v11  ;;  %1153 = vmatpush.bf16.msra.mxu1 %v1476_v12  ;;  %v1854_v11 = vld [vmem:[#allocation8 + $0x34c] sm:$0xf]  ;;  %v1665_v12 = vld [vmem:[#allocation8 + $0x358] sm:$0xf0] }
  0xc6   :  { %1121 = vmatmul.bf16.vlgmr.msrb.gmra.mxu2 %v2086_v50  ;;  %1134 = vmatmul.bf16.vlgmr.msrb.gmra.mxu3 %v2088_v51 }
  0xc7   :  { %1165 = vmatpush.bf16.msra.mxu2 %v1620_v19  ;;  %1178 = vmatpush.bf16.msra.mxu3 %v1748_v20  ;;  %v1540_v19 = vor.u32 %v1822_v9, %v1537_v10  ;;  %v1668_v20 = vor.u32 %v1854_v11, %v1665_v12  ;;  %v1196_v10 = vunpack.c.l.bf16 %v1195_v3  ;;  %v338_v12 = vperm.slane %v333_v37, 3 }
  0xc9   :  { %1141 = vmatpush.bf16.msra.mxu0 %v1332_v27  ;;  %1154 = vmatpush.bf16.msra.mxu1 %v1460_v28  ;;  %v1252_v27 = vor.u32 %v1750_v15, %v1249_v16  ;;  %v1380_v28 = vor.u32 %v1782_v17, %v1377_v18  ;;  %v1198_v16 = vperm.slane %v1196_v10, 0  ;;  %v1200_v18 = vperm.slane %v1196_v10, 4 }
  0xca   :  { %v1201_v31 = vperm.slane %v1196_v10, 6 }
  0xcb   :  { %1166 = vmatpush.bf16.msra.mxu2 %v1604_v33  ;;  %1179 = vmatpush.bf16.msra.mxu3 %v1732_v34  ;;  %v1846_v33 = vld [vmem:[#allocation8 + $0x30c] sm:$0xf]  ;;  %v1633_v34 = vld [vmem:[#allocation8 + $0x318] sm:$0xf0] }
  0xcc   :  { %v1636_v36 = vor.u32 %v1846_v33, %v1633_v34 }
  0xcd   :  { %1142 = vmatpush.bf16.msra.mxu0 %v1316_v39  ;;  %1155 = vmatpush.bf16.msra.mxu1 %v1444_v40 }
  0xcf   :  { %1167 = vmatpush.bf16.msra.mxu2 %v1588_v45  ;;  %1180 = vmatpush.bf16.msra.mxu3 %v1716_v46 }
  0xd1   :  { %1143 = vmatpush.bf16.msra.mxu0 %v1300_v53  ;;  %1156 = vmatpush.bf16.msra.mxu1 %v1428_v54 }
  0xd3   :  { %1168 = vmatpush.bf16.msra.mxu2 %v1572_v59  ;;  %1181 = vmatpush.bf16.msra.mxu3 %v1700_v60 }
  0xd5   :  { %1144 = vmatpush.bf16.msra.mxu0 %v1284_v1  ;;  %1157 = vmatpush.bf16.msra.mxu1 %v1412_v2 }
  0xd7   :  { %1169 = vmatpush.bf16.msra.mxu2 %v1556_v7  ;;  %1182 = vmatpush.bf16.msra.mxu3 %v1684_v8 }
  0xd9   :  { %1145 = vmatpush.bf16.msra.mxu0 %v1268_v13  ;;  %1158 = vmatpush.bf16.msra.mxu1 %v1396_v14  ;;  %v1199_v14 = vperm.slane %v1196_v10, 2 }
  0xdb   :  { %1170 = vmatpush.bf16.msra.mxu2 %v1540_v19  ;;  %1183 = vmatpush.bf16.msra.mxu3 %v1668_v20  ;;  %v1207_v23 = vperm.slane %v1199_v14, 0 }
  0xdd   :  { %1146 = vmatpush.bf16.msra.mxu0 %v1252_v27  ;;  %1159 = vmatpush.bf16.msra.mxu1 %v1380_v28  ;;  %v1206_v27 = vperm.slane %v1198_v16, 0 }
  0xdf   :  { %1171 = vmatpush.bf16.msra.mxu2 %v1524_v29  ;;  %1184 = vmatpush.bf16.msra.mxu3 %v1652_v30  ;;  %v1208_v29 = vperm.slane %v1200_v18, 0 }
  0xe0   :  { %1147 = vmatmul.bf16.vlgmr.msra.gmra.mxu0 %v2080_v25  ;;  %1160 = vmatmul.bf16.vlgmr.msra.gmra.mxu1 %v2082_v26 }
  0xe3   :  { %1172 = vmatpush.bf16.msra.mxu2 %v1508_v35  ;;  %1185 = vmatpush.bf16.msra.mxu3 %v1636_v36 }
  0xe6   :  { %1173 = vmatmul.bf16.vlgmr.msra.gmra.mxu2 %v2086_v50  ;;  %1186 = vmatmul.bf16.vlgmr.msra.gmra.mxu3 %v2088_v51 }
 0x11c   :  { %v992_v39 = vpop.f32.mrf.mxu0  ;;  %v1005_v40 = vpop.f32.mrf.mxu1 }
 0x11d   :  { %v993_v41 = vadd.f32 %v992_v39, %v335_v38  ;;  %v1209_v39 = vperm.slane %v1201_v31, 0 }
 0x11f   :  { %v1006_v42 = vadd.f32 %v1005_v40, %v993_v41 }
 0x124   :  { %v994_v43 = vpop.f32.mrf.mxu0  ;;  %v1007_v44 = vpop.f32.mrf.mxu1 }
 0x129   :  { %v1018_v25 = vpop.f32.mrf.mxu2  ;;  %v1031_v45 = vpop.f32.mrf.mxu3 }
 0x12a   :  { %v1019_v9 = vadd.f32 %v1018_v25, %v1006_v42 }
 0x12c   :  { %v1032_v15 = vadd.f32 %v1031_v45, %v1019_v9 }
 0x12d   :  { %v1044_v26 = vpop.f32.mrf.mxu0  ;;  %v1057_v46 = vpop.f32.mrf.mxu1 }
 0x12e   :  { %v1045_v1 = vadd.f32 %v1044_v26, %v336_v61  ;;  %v1191_v24 = vmax.f32 %v1032_v15, 0.0  ;;  %v1884_v26 = vld [vmem:[#allocation2] ss:$0 sm:$0xff] }
 0x130   :  { %v1058_v4 = vadd.f32 %v1057_v46, %v1045_v1  ;;  %v1210_v36 = vmul.f32 %v1206_v27, %v1191_v24 }
 0x131   :  { %v1020_v47 = vpop.f32.mrf.mxu2  ;;  %v1033_v48 = vpop.f32.mrf.mxu3 }
 0x135   :  { %v1046_v50 = vpop.f32.mrf.mxu0  ;;  %v1059_v49 = vpop.f32.mrf.mxu1 }
 0x139   :  { %v1070_v51 = vpop.f32.mrf.mxu2  ;;  %v1083_v52 = vpop.f32.mrf.mxu3 }
 0x13a   :  { %v1071_v7 = vadd.f32 %v1070_v51, %v1058_v4 }
 0x13c   :  { %v1084_v13 = vadd.f32 %v1083_v52, %v1071_v7 }
 0x13d   :  { %v1096_v53 = vpop.f32.mrf.mxu0  ;;  %v1109_v54 = vpop.f32.mrf.mxu1 }
 0x13e   :  { %v1097_v2 = vadd.f32 %v1096_v53, %v337_v0  ;;  %v1192_v22 = vmax.f32 %v1084_v13, 0.0 }
 0x140   :  { %v1110_v8 = vadd.f32 %v1109_v54, %v1097_v2  ;;  %v1211_v34 = vmul.f32 %v1207_v23, %v1192_v22 }
 0x141   :  { %v1072_v55 = vpop.f32.mrf.mxu2  ;;  %v1085_v56 = vpop.f32.mrf.mxu3 }
 0x142   :  { %v1214_v41 = vadd.f32 %v1211_v34, %v1210_v36 }
 0x145   :  { %v1098_v57 = vpop.f32.mrf.mxu0  ;;  %v1111_v58 = vpop.f32.mrf.mxu1 }
 0x149   :  { %v1122_v59 = vpop.f32.mrf.mxu2  ;;  %v1135_v60 = vpop.f32.mrf.mxu3 }
 0x14a   :  { %v1123_v11 = vadd.f32 %v1122_v59, %v1110_v8 }
 0x14c   :  { %v1136_v17 = vadd.f32 %v1135_v60, %v1123_v11 }
 0x14e   :  { %v1193_v28 = vmax.f32 %v1136_v17, 0.0 }
 0x150   :  { %v1212_v37 = vmul.f32 %v1208_v29, %v1193_v28 }
 0x151   :  { %v1124_v62 = vpop.f32.mrf.mxu2  ;;  %v1137_v63 = vpop.f32.mrf.mxu3 }
 0x152   :  { %v1215_v43 = vadd.f32 %v1214_v41, %v1212_v37 }
 0x15d   :  { %v1148_v5 = vpop.f32.mrf.mxu0  ;;  %v1161_v6 = vpop.f32.mrf.mxu1 }
 0x15e   :  { %v1149_v19 = vadd.f32 %v1148_v5, %v338_v12 }
 0x160   :  { %v1162_v30 = vadd.f32 %v1161_v6, %v1149_v19 }
 0x165   :  { %v1150_v20 = vpop.f32.mrf.mxu0  ;;  %v1163_v21 = vpop.f32.mrf.mxu1 }
 0x169   :  { %v1174_v32 = vpop.f32.mrf.mxu2  ;;  %v1187_v33 = vpop.f32.mrf.mxu3 }
 0x16a   :  { %v1175_v35 = vadd.f32 %v1174_v32, %v1162_v30 }
 0x16c   :  { %v1188_v38 = vadd.f32 %v1187_v33, %v1175_v35 }
 0x16e   :  { %v1194_v40 = vmax.f32 %v1188_v38, 0.0 }
 0x170   :  { %v1213_v42 = vmul.f32 %v1209_v39, %v1194_v40 }
 0x171   :  { %v1176_v44 = vpop.f32.mrf.mxu2  ;;  %v1189_v25 = vpop.f32.mrf.mxu3 }
 0x172   :  { %v1216_v45 = vadd.f32 %v1215_v43, %v1213_v42 }
 0x174   :  { %1217 = vadd.xlane.f32.xlu0 %v1216_v45 }
 0x1e7   :  { %v1218_v46 = vpop.xlane.xlu0 %1217 }
 0x1e8   :  { %v1223_v47 = vadd.f32 %v1884_v26, %v1218_v46 }
 0x1ea   :  { %1225 = vst.msk [vmem:[%s2117_s7] sm:$0xff] %vm1224_vm1, %v1223_v47 }
 0x1eb   :  { %1230 = vsyncpa [#allocation4], 1 }
 0x1ec   :  { %1231 = vsyncpa [#allocation6], 1 }
 0x1ed   :  { %1232 = vsyncpa [#allocation9], 1 }

</bundles_post_ra>
